<compile_context>
chip_gen: v6e
topology: v6e:2x2x1
jax: 0.10.0
libtpu: 0.0.40
codegen_flags: <defaults>
</compile_context>

<pallas_src>
import jax
import jax.numpy as jnp
from jax.experimental import pallas as pl
from jax.experimental.pallas import tpu as pltpu

LEAKY_SLOPE = 0.01  # torch.nn.LeakyReLU() default negative_slope


def _leaky_relu(x):
    # Single vmax per element (valid for 0 < slope < 1).
    return jnp.maximum(x, LEAKY_SLOPE * x)


def _round_up(x, m):
    return ((x + m - 1) // m) * m


def discriminator_kernel(xt_ref, ht_ref, w1t_ref, w2t_ref, w3t_ref, o_ref):
    """One column tile (tile rows of the batch) of the 3-layer MLP.

    Activations are kept in the transposed (features, rows) layout so M lives
    on the lane axis:
        xh     : (2*H1, TM)
        h1, h2 : (H2,  TM)
        out    : (1,   TM)   -> lane-dense store
    """
    # Fused layer-1: stack x^T / h^T along the contraction (sublane) axis so
    # layer 1 is one K = 2*H1 dot instead of two K = H1 dots + a VPU add.
    xh = jnp.concatenate([xt_ref[...], ht_ref[...]], axis=0)            # (2*H1, TM)
    h1 = _leaky_relu(
        jnp.dot(w1t_ref[...], xh, preferred_element_type=jnp.float32))  # (H2, TM)
    h2 = _leaky_relu(
        jnp.dot(w2t_ref[...], h1, preferred_element_type=jnp.float32))  # (H2, TM)
    logits = jnp.dot(w3t_ref[...], h2,
                     preferred_element_type=jnp.float32)                # (1, TM)
    o_ref[...] = jax.nn.sigmoid(logits)


def _choose_tile(m, tile_m):
    """Pick a lane-dense column tile.

    * Small problems (m <= 512): one step, tile == m (full-dim block, no
      128-lane divisibility requirement).
    * Otherwise: tile is a multiple of 256 (fills the 256-wide MXU columns on
      v6e/v7x, lane-dense stores) and is capped at ~m/2 so the grid has at
      least two steps (v7x megacore uses both TensorCores).
    """
    tile_m = max(256, (tile_m // 256) * 256)
    if m <= 512:
        return m
    half = _round_up((m + 1) // 2, 256)   # >= 512 and strictly < m
    return min(tile_m, half)


def discriminator_forward(new_x, h, D_W1, D_W2, D_W3, *, tile_m=8192):
    """Pallas-backed Discriminator.forward.

    new_x, h : (B, T, H1)
    D_W1     : (2*H1, H2), D_W2 : (H2, H2), D_W3 : (H2, 1)
    returns  : (B, T, 1) float32
    """
    B, T, H1 = new_x.shape
    H2 = D_W2.shape[0]
    assert D_W1.shape == (2 * H1, H2)
    assert D_W3.shape == (H2, 1)
    M = B * T

    tile = _choose_tile(M, tile_m)
    grid = (pl.cdiv(M, tile),)

    # Transposed (feature-major) activation slabs: M on the lane axis.  One
    # cheap XLA transpose of (M, 16) data each; no padded copies (the grid
    # handles the ragged last block).
    x_t = new_x.reshape(M, H1).astype(jnp.float32).T        # (H1, M)
    h_t = h.reshape(M, H1).astype(jnp.float32).T            # (H1, M)

    # Transposed weights so every layer is  W^T @ activation  (tiny arrays).
    W1t = D_W1.astype(jnp.float32).T                        # (H2, 2*H1)
    W2t = D_W2.astype(jnp.float32).T                        # (H2, H2)
    W3t = D_W3.astype(jnp.float32).T                        # (1, H2)

    out = pl.pallas_call(
        discriminator_kernel,
        out_shape=jax.ShapeDtypeStruct((1, M), jnp.float32),
        grid_spec=pltpu.PrefetchScalarGridSpec(
            num_scalar_prefetch=0,
            grid=grid,
            in_specs=[
                pl.BlockSpec((H1, tile), lambda i: (0, i)),      # x^T column tile
                pl.BlockSpec((H1, tile), lambda i: (0, i)),      # h^T column tile
                pl.BlockSpec((H2, 2 * H1), lambda i: (0, 0)),    # W1^T (resident)
                pl.BlockSpec((H2, H2), lambda i: (0, 0)),        # W2^T (resident)
                pl.BlockSpec((1, H2), lambda i: (0, 0)),         # W3^T (resident)
            ],
            out_specs=pl.BlockSpec((1, tile), lambda i: (0, i)),
        ),
        compiler_params=pltpu.CompilerParams(
            dimension_semantics=("parallel",),
        ),
    )(x_t, h_t, W1t, W2t, W3t)

    return out.reshape(B, T, 1)


def xavier_normal(key, shape, dtype=jnp.float32):
    fan_in, fan_out = shape[0], shape[1]
    std = (2.0 / (fan_in + fan_out)) ** 0.5
    return std * jax.random.normal(key, shape, dtype=dtype)


def reference_forward(new_x, h, D_W1, D_W2, D_W3):
    inputs = jnp.concatenate([new_x, h], axis=2)
    d_h1 = jnp.where(inputs @ D_W1 > 0, inputs @ D_W1, LEAKY_SLOPE * (inputs @ D_W1))
    d_h2 = jnp.where(d_h1 @ D_W2 > 0, d_h1 @ D_W2, LEAKY_SLOPE * (d_h1 @ D_W2))
    return jax.nn.sigmoid(d_h2 @ D_W3)


if __name__ == "__main__":
    # Small shapes consistent with the module: H_Dim1=16, H_Dim2=32.
    H1, H2 = 16, 32

    key = jax.random.PRNGKey(0)
    k_w1, k_w2, k_w3, k_x, k_h = jax.random.split(key, 5)

    # Deterministic xavier-normal parameter init (matches __init__ shapes).
    D_W1 = xavier_normal(k_w1, (H1 * 2, H2))
    D_W2 = xavier_normal(k_w2, (H2, H2))
    D_W3 = xavier_normal(k_w3, (H2, 1))

    # Case 1: tiny, single grid step (tile == M).
    B, T = 2, 8
    new_x = jax.random.normal(k_x, (B, T, H1), dtype=jnp.float32)
    h = jax.random.normal(k_h, (B, T, H1), dtype=jnp.float32)

    out = jax.block_until_ready(discriminator_forward(new_x, h, D_W1, D_W2, D_W3))
    ref = reference_forward(new_x, h, D_W1, D_W2, D_W3)
    assert out.shape == (B, T, 1)
    assert jnp.allclose(out, ref, atol=1e-5, rtol=1e-5)

    # Case 2: M not a multiple of 8 -> single ragged block.
    B2, T2 = 3, 5
    new_x2 = jax.random.normal(jax.random.PRNGKey(1), (B2, T2, H1), dtype=jnp.float32)
    h2 = jax.random.normal(jax.random.PRNGKey(2), (B2, T2, H1), dtype=jnp.float32)

    out2 = jax.block_until_ready(discriminator_forward(new_x2, h2, D_W1, D_W2, D_W3))
    ref2 = reference_forward(new_x2, h2, D_W1, D_W2, D_W3)
    assert out2.shape == (B2, T2, 1)
    assert jnp.allclose(out2, ref2, atol=1e-5, rtol=1e-5)

    # Case 3: M > 512 -> multi-step grid (256-multiple tile, >=2 steps,
    # ragged last block masked by Pallas).
    B3, T3 = 4, 200
    new_x3 = jax.random.normal(jax.random.PRNGKey(3), (B3, T3, H1), dtype=jnp.float32)
    h3 = jax.random.normal(jax.random.PRNGKey(4), (B3, T3, H1), dtype=jnp.float32)

    out3 = jax.block_until_ready(discriminator_forward(new_x3, h3, D_W1, D_W2, D_W3))
    ref3 = reference_forward(new_x3, h3, D_W1, D_W2, D_W3)
    assert out3.shape == (B3, T3, 1)
    assert jnp.allclose(out3, ref3, atol=1e-5, rtol=1e-5)

    print("KERNEL_OK")
</pallas_src>

<mosaic_0001>
module attributes {stable_mosaic.version = 11 : i64} {
  func.func @discriminator_kernel(%arg0: i32, %arg1: memref<16x16xf32, #tpu.memory_space<vmem>>, %arg2: memref<16x16xf32, #tpu.memory_space<vmem>>, %arg3: memref<32x32xf32, #tpu.memory_space<vmem>>, %arg4: memref<32x32xf32, #tpu.memory_space<vmem>>, %arg5: memref<1x32xf32, #tpu.memory_space<vmem>>, %arg6: memref<1x16xf32, #tpu.memory_space<vmem>>) attributes {dimension_semantics = [#tpu.dimension_semantics<parallel>], iteration_bounds = array<i64: 1>, scalar_prefetch = 0 : i64, scratch_operands = 0 : i64, tpu.core_type = #tpu.core_type<tc>, window_params = [{transform_indices = @transform_0, window_bounds = array<i64: 16, 16>}, {transform_indices = @transform_1, window_bounds = array<i64: 16, 16>}, {pipeline_mode = #tpu.pipeline_mode<synchronous>, transform_indices = @transform_2, window_bounds = array<i64: 32, 32>}, {pipeline_mode = #tpu.pipeline_mode<synchronous>, transform_indices = @transform_3, window_bounds = array<i64: 32, 32>}, {pipeline_mode = #tpu.pipeline_mode<synchronous>, transform_indices = @transform_4, window_bounds = array<i64: 1, 32>}, {transform_indices = @transform_5, window_bounds = array<i64: 1, 16>}]} {
    %c0 = arith.constant 0 : index
    %c0_0 = arith.constant 0 : index
    %0 = vector.load %arg1[%c0, %c0_0] : memref<16x16xf32, #tpu.memory_space<vmem>>, vector<16x16xf32>
    %c0_1 = arith.constant 0 : index
    %c0_2 = arith.constant 0 : index
    %1 = vector.load %arg2[%c0_1, %c0_2] : memref<16x16xf32, #tpu.memory_space<vmem>>, vector<16x16xf32>
    %2 = tpu.concatenate %0, %1 in 0 : vector<16x16xf32>, vector<16x16xf32> -> vector<32x16xf32>
    %c0_3 = arith.constant 0 : index
    %c0_4 = arith.constant 0 : index
    %3 = vector.load %arg3[%c0_3, %c0_4] : memref<32x32xf32, #tpu.memory_space<vmem>>, vector<32x32xf32>
    %cst = arith.constant dense<0.000000e+00> : vector<32x16xf32>
    %4 = tpu.matmul %3, %2, %cst {dimension_numbers = #tpu.dot_dimension_numbers<[1], [0], [0], [1], [0, 0, 1, 1], [], []>} : vector<32x32xf32>, vector<32x16xf32>, vector<32x16xf32> -> vector<32x16xf32>
    %cst_5 = arith.constant 0.00999999977 : f32
    %5 = vector.broadcast %cst_5 : f32 to vector<32x16xf32>
    %6 = arith.mulf %5, %4 : vector<32x16xf32>
    %7 = arith.maximumf %4, %6 : vector<32x16xf32>
    %c0_6 = arith.constant 0 : index
    %c0_7 = arith.constant 0 : index
    %8 = vector.load %arg4[%c0_6, %c0_7] : memref<32x32xf32, #tpu.memory_space<vmem>>, vector<32x32xf32>
    %cst_8 = arith.constant dense<0.000000e+00> : vector<32x16xf32>
    %9 = tpu.matmul %8, %7, %cst_8 {dimension_numbers = #tpu.dot_dimension_numbers<[1], [0], [0], [1], [0, 0, 1, 1], [], []>} : vector<32x32xf32>, vector<32x16xf32>, vector<32x16xf32> -> vector<32x16xf32>
    %cst_9 = arith.constant 0.00999999977 : f32
    %10 = vector.broadcast %cst_9 : f32 to vector<32x16xf32>
    %11 = arith.mulf %10, %9 : vector<32x16xf32>
    %12 = arith.maximumf %9, %11 : vector<32x16xf32>
    %c0_10 = arith.constant 0 : index
    %c0_11 = arith.constant 0 : index
    %13 = vector.load %arg5[%c0_10, %c0_11] : memref<1x32xf32, #tpu.memory_space<vmem>>, vector<1x32xf32>
    %cst_12 = arith.constant dense<0.000000e+00> : vector<1x16xf32>
    %14 = tpu.matmul %13, %12, %cst_12 {dimension_numbers = #tpu.dot_dimension_numbers<[1], [0], [0], [1], [0, 0, 1, 1], [], []>} : vector<1x32xf32>, vector<32x16xf32>, vector<1x16xf32> -> vector<1x16xf32>
    %15 = arith.negf %14 : vector<1x16xf32>
    %16 = math.exp %15 : vector<1x16xf32>
    %cst_13 = arith.constant 1.000000e+00 : f32
    %17 = vector.broadcast %cst_13 : f32 to vector<1x16xf32>
    %18 = arith.addf %17, %16 : vector<1x16xf32>
    %19 = arith.divf %17, %18 : vector<1x16xf32>
    %c0_14 = arith.constant 0 : index
    %c0_15 = arith.constant 0 : index
    %20 = vector.load %arg6[%c0_14, %c0_15] : memref<1x16xf32, #tpu.memory_space<vmem>>, vector<1x16xf32>
    tpu.vector_store %arg6[%c0_14, %c0_15], %19 {strides = array<i32>} : memref<1x16xf32, #tpu.memory_space<vmem>>, vector<1x16xf32>,
    return
  }
  func.func @transform_0(%arg0: i32) -> (i32, i32) {
    %c0_i32 = arith.constant 0 : i32
    %c0_i32_0 = arith.constant 0 : i32
    return %c0_i32, %arg0 : i32, i32
  }
  func.func @transform_1(%arg0: i32) -> (i32, i32) {
    %c0_i32 = arith.constant 0 : i32
    %c0_i32_0 = arith.constant 0 : i32
    return %c0_i32, %arg0 : i32, i32
  }
  func.func @transform_2(%arg0: i32) -> (i32, i32) {
    %c0_i32 = arith.constant 0 : i32
    %c0_i32_0 = arith.constant 0 : i32
    %c0_i32_1 = arith.constant 0 : i32
    return %c0_i32, %c0_i32_0 : i32, i32
  }
  func.func @transform_3(%arg0: i32) -> (i32, i32) {
    %c0_i32 = arith.constant 0 : i32
    %c0_i32_0 = arith.constant 0 : i32
    %c0_i32_1 = arith.constant 0 : i32
    return %c0_i32, %c0_i32_0 : i32, i32
  }
  func.func @transform_4(%arg0: i32) -> (i32, i32) {
    %c0_i32 = arith.constant 0 : i32
    %c0_i32_0 = arith.constant 0 : i32
    %c0_i32_1 = arith.constant 0 : i32
    return %c0_i32, %c0_i32_0 : i32, i32
  }
  func.func @transform_5(%arg0: i32) -> (i32, i32) {
    %c0_i32 = arith.constant 0 : i32
    %c0_i32_0 = arith.constant 0 : i32
    return %c0_i32, %arg0 : i32, i32
  }
}

</mosaic_0001>

<bundles_post_ra>
// kernel: tpu_custom_call.1
= control target key start
LH: loop header
LB: loop body
LE: loop exit
PB: predicated region body
PF: predicated region fallthrough
CT: control target
= control target key end

     0   :  { %10 = vsyncpa [#allocation3], 0  ;;  %s667_s0 = inlined_call_operand.hbm [shape: f32[16,16], index: 0, kind: input, shape index: {}]   ;;  %s668_s1 = inlined_call_operand.hbm [shape: f32[16,16], index: 1, kind: input, shape index: {}]   ;;  %s669_s2 = inlined_call_operand.hbm [shape: f32[32,32], index: 2, kind: input, shape index: {}]   ;;  %s670_s3 = inlined_call_operand.hbm [shape: f32[32,32], index: 3, kind: input, shape index: {}]   ;;  %s671_s4 = inlined_call_operand.vmem [shape: f32[1,32], index: 4, kind: input, shape index: {}]   ;;  %s672_s5 = inlined_call_operand.hbm [shape: f32[1,16], index: 5, kind: output, shape index: {}]  }
   0x1   :  { %11 = vsyncpa [#allocation6], 0 }
   0x2   :  { %12 = vsyncpa [#allocation9], 0 }
   0x3   :  { %13 = vsyncpa [#allocation4], 0  ;;  %s589_s18 = smov [#allocation5]   ;;  %s590_s20 = smov [#allocation2]  }
   0x4   :  { %s31_s19 = sshll.u32 %s589_s18, 4  ;;  %s19_s21 = sshll.u32 %s590_s20, 4  ;;  %s32_s19 = int_to_ptr.vmem [resolvable:$true] %s31_s19  ;;  %s20_s21 = int_to_ptr.vmem [resolvable:$true] %s19_s21 }
   0x5   :  { %s489_s22 = scalar_lea.vmem %s32_s19, 256  ;;  %p494_p1 = scmp.lt.s32.totalorder %s32_s19, %s32_s19 }
   0x6   :  { %p490_p0 = scmp.ne.s32.totalorder %s32_s19, %s489_s22  ;;  %p495_p2 = scmp.lt.s32.totalorder %s489_s22, %s489_s22 }
   0x8   :  { %p496_p3 = por %p495_p2, %p494_p1 }
   0xa   :  { %p497_p4 = pnand %p496_p3, %p490_p0 }
   0xc   :  { %500 = shalt.err (!%p497_p4)
}
   0xd   :  { %s591_s23 = smov 128   ;;  %s592_s24 = smov 8  }
   0xe   :  { %37 = dma.hbm_to_vmem [thread:$0]  %s668_s1, 256, %s32_s19, [#allocation6], %s591_s23, %s591_s23, %s592_s24  }
   0xf   :  { %s509_s27 = scalar_lea.vmem %s20_s21, 256  ;;  %p514_p6 = scmp.lt.s32.totalorder %s20_s21, %s20_s21 }
  0x10   :  { %p510_p5 = scmp.ne.s32.totalorder %s20_s21, %s509_s27  ;;  %p515_p7 = scmp.lt.s32.totalorder %s509_s27, %s509_s27 }
  0x12   :  { %p516_p8 = por %p515_p7, %p514_p6 }
  0x14   :  { %p517_p9 = pnand %p516_p8, %p510_p5 }
  0x16   :  { %520 = shalt.err (!%p517_p9)
}
  0x17   :  { %25 = dma.hbm_to_vmem [thread:$0]  %s667_s0, 256, %s20_s21, [#allocation3], %s591_s23, %s591_s23, %s592_s24  }
  0x18   :  { %s593_s30 = smov [#allocation7]   ;;  %s594_s7 = smov [#allocation8]  }
  0x19   :  { %s43_s6 = sshll.u32 %s593_s30, 4  ;;  %s55_s8 = sshll.u32 %s594_s7, 4  ;;  %s44_s6 = int_to_ptr.vmem [resolvable:$true] %s43_s6  ;;  %s56_s8 = int_to_ptr.vmem [resolvable:$true] %s55_s8 }
  0x1a   :  { %s529_s1 = scalar_lea.vmem %s44_s6, 512  ;;  %p534_p11 = scmp.lt.s32.totalorder %s44_s6, %s44_s6 }
  0x1b   :  { %p530_p10 = scmp.ne.s32.totalorder %s44_s6, %s529_s1  ;;  %p535_p12 = scmp.lt.s32.totalorder %s529_s1, %s529_s1 }
  0x1d   :  { %p536_p13 = por %p535_p12, %p534_p11 }
  0x1f   :  { %p537_p0 = pnand %p536_p13, %p530_p10 }
  0x21   :  { %540 = shalt.err (!%p537_p0)
}
  0x22   :  { %49 = dma.hbm_to_vmem [thread:$0]  %s669_s2, 512, %s44_s6, [#allocation6], %s591_s23, %s591_s23, %s592_s24  }
  0x23   :  { %s549_s0 = scalar_lea.vmem %s56_s8, 512  ;;  %p554_p2 = scmp.lt.s32.totalorder %s56_s8, %s56_s8 }
  0x24   :  { %p550_p1 = scmp.ne.s32.totalorder %s56_s8, %s549_s0  ;;  %p555_p3 = scmp.lt.s32.totalorder %s549_s0, %s549_s0 }
  0x26   :  { %p556_p4 = por %p555_p3, %p554_p2 }
  0x28   :  { %p557_p5 = pnand %p556_p4, %p550_p1 }
  0x2a   :  { %560 = shalt.err (!%p557_p5)
}
  0x2b   :  { %61 = dma.hbm_to_vmem [thread:$0]  %s670_s3, 512, %s56_s8, [#allocation9], %s591_s23, %s591_s23, %s592_s24  }
  0x2c   :  { %581 = dma.done.wait [#allocation3], 256  }
  0x2d   :  { %582 = vsyncadd [#allocation3], 4294967040 }
  0x2e   :  { %583 = dma.done.wait [#allocation6], 768  }
  0x2f   :  { %584 = vsyncadd [#allocation6], 4294966528 }
  0x30   :  { %585 = dma.done.wait [#allocation9], 512  }
  0x31   :  { %586 = vsyncadd [#allocation9], 4294966784  ;;  %vm84_vm0 = vcmask 261120   ;;  %v79_v0 = vld [vmem:[#allocation5 + $0x8] sm:$0xff]  ;;  %v78_v1 = vld [vmem:[#allocation5] sm:$0xff]  ;;  %v595_v24 = vmov 0.0  }
  0x32   :  { %429 = vmatprep.subr.mxu0 %v79_v0  ;;  %v80_v2 = vld [vmem:[#allocation7] sm:$0xff]  ;;  %v77_v3 = vld [vmem:[#allocation2 + $0x8] sm:$0xff]  ;;  %v82_v6 = vld [vmem:[#allocation7 + $0x10] sm:$0xff]  ;;  %vm596_vm1 = vmmov 0   ;;  %s597_s13 = smov [#allocation10]   ;;  %vm379_vm2 = vcmask 122880  }
  0x33   :  { %430 = vmatpush3.msra.mxu0 %v79_v0  ;;  %437 = vmatprep.mubr.msk.f32.mxu0 %vm84_vm0, %v80_v2  ;;  %v76_v4 = vld [vmem:[#allocation2] sm:$0xff]  ;;  %v81_v5 = vld [vmem:[#allocation7 + $0x8] sm:$0xff]  ;;  %v83_v7 = vld [vmem:[#allocation7 + $0x18] sm:$0xff]  ;;  %s387_s14 = sshll.u32 %s597_s13, 4  ;;  %s388_s14 = int_to_ptr.vmem [resolvable:$true] %s387_s14 }
  0x34   :  { %431 = vmatprep.subr.mxu0 %v78_v1  ;;  %v190_v8 = vld [vmem:[#allocation8] sm:$0xff]  ;;  %v191_v21 = vld [vmem:[#allocation8 + $0x8] sm:$0xff]  ;;  %v192_v22 = vld [vmem:[#allocation8 + $0x10] sm:$0xff]  ;;  %s561_s15 = scalar_lea.vmem %s388_s14, 16  ;;  %p566_p7 = scmp.lt.s32.totalorder %s388_s14, %s388_s14 }
  0x35   :  { %432 = vmatpush3.msra.mxu0 %v78_v1  ;;  %451 = vmatprep.mubr.msk.f32.mxu1 %vm84_vm0, %v190_v8  ;;  %v193_v23 = vld [vmem:[#allocation8 + $0x18] sm:$0xff]  ;;  %v299_v37 = vld [vmem:[%s671_s4] sm:$0x1]  ;;  %p562_p6 = scmp.ne.s32.totalorder %s388_s14, %s561_s15  ;;  %s565_s4 = scalar_lea.vmem %s388_s14, 32 }
  0x36   :  { %433 = vmatprep.subr.mxu0 %v77_v3  ;;  %p567_p8 = scmp.lt.s32.totalorder %s565_s4, %s561_s15 }
  0x37   :  { %434 = vmatpush3.msra.mxu0 %v77_v3 }
  0x38   :  { %435 = vmatprep.subr.mxu0 %v76_v4  ;;  %p568_p9 = por %p567_p8, %p566_p7 }
  0x39   :  { %436 = vmatpush3.msra.mxu0 %v76_v4 }
  0x3a   :  { %438 = vmatmul.mubr.msk.f32.vlgmr.msra.gmra.mxu0 %vm84_vm0, %v81_v5  ;;  %457 = vmatprep.subr.mxu0 %v595_v24  ;;  %p569_p10 = pnand %p568_p9, %p562_p6 }
  0x3b   :  { %440 = vmatprep.mubr.msk.f32.mxu0 %vm84_vm0, %v82_v6 }
  0x3e   :  { %441 = vmatmul.mubr.msk.f32.gmra.mxu0 %vm84_vm0, %v83_v7 }
  0x3f   :  { %465 = vmatprep.mubr.msk.f32.mxu0 %vm596_vm1, %v595_v24 }
  0xfa   :  { %v439_v9 = vpop.f32.mrf.mxu0 }
  0xfb   :  { %v183_v14 = vmul.f32 0.01, %v439_v9 }
  0xfc   :  { %v163_v10 = vpop.f32.mrf.mxu0 }
  0xfd   :  { %v182_v17 = vmul.f32 0.01, %v163_v10  ;;  %v187_v19 = vmax.f32 %v439_v9, %v183_v14 }
  0xfe   :  { %v442_v11 = vpop.f32.mrf.mxu0 }
  0xff   :  { %v185_v12 = vmul.f32 0.01, %v442_v11  ;;  %v186_v20 = vmax.f32 %v163_v10, %v182_v17 }
 0x100   :  { %v173_v13 = vpop.f32.mrf.mxu0 }
 0x101   :  { %v184_v15 = vmul.f32 0.01, %v173_v13  ;;  %v189_v16 = vmax.f32 %v442_v11, %v185_v12 }
 0x103   :  { %v188_v18 = vmax.f32 %v173_v13, %v184_v15  ;;  %443 = vmatprep.subr.mxu1 %v189_v16 }
 0x104   :  { %444 = vmatpush3.msra.mxu1 %v189_v16 }
 0x105   :  { %445 = vmatprep.subr.mxu1 %v188_v18 }
 0x106   :  { %446 = vmatpush3.msra.mxu1 %v188_v18 }
 0x107   :  { %447 = vmatprep.subr.mxu1 %v187_v19 }
 0x108   :  { %448 = vmatpush3.msra.mxu1 %v187_v19 }
 0x109   :  { %449 = vmatprep.subr.mxu1 %v186_v20 }
 0x10a   :  { %450 = vmatpush3.msra.mxu1 %v186_v20 }
 0x10b   :  { %452 = vmatmul.mubr.msk.f32.vlgmr.msra.gmra.mxu1 %vm84_vm0, %v191_v21 }
 0x10c   :  { %454 = vmatprep.mubr.msk.f32.mxu1 %vm84_vm0, %v192_v22 }
 0x10f   :  { %455 = vmatmul.mubr.msk.f32.gmra.mxu1 %vm84_vm0, %v193_v23 }
 0x1cb   :  { %v453_v25 = vpop.f32.mrf.mxu1 }
 0x1cc   :  { %v292_v30 = vmul.f32 0.01, %v453_v25 }
 0x1cd   :  { %v272_v26 = vpop.f32.mrf.mxu1 }
 0x1ce   :  { %v291_v33 = vmul.f32 0.01, %v272_v26  ;;  %v296_v35 = vmax.f32 %v453_v25, %v292_v30 }
 0x1cf   :  { %v456_v27 = vpop.f32.mrf.mxu1 }
 0x1d0   :  { %v294_v28 = vmul.f32 0.01, %v456_v27  ;;  %v295_v36 = vmax.f32 %v272_v26, %v291_v33 }
 0x1d1   :  { %v282_v29 = vpop.f32.mrf.mxu1 }
 0x1d2   :  { %v298_v31 = vmax.f32 %v456_v27, %v294_v28  ;;  %v293_v32 = vmul.f32 0.01, %v282_v29 }
 0x1d4   :  { %v297_v34 = vmax.f32 %v282_v29, %v293_v32  ;;  %458 = vmatpush3.msra.mxu0 %v298_v31 }
 0x1d5   :  { %459 = vmatprep.subr.mxu0 %v595_v24 }
 0x1d6   :  { %460 = vmatpush3.msra.mxu0 %v297_v34 }
 0x1d7   :  { %461 = vmatprep.subr.mxu0 %v595_v24 }
 0x1d8   :  { %462 = vmatpush3.msra.mxu0 %v296_v35 }
 0x1d9   :  { %463 = vmatprep.subr.mxu0 %v595_v24 }
 0x1da   :  { %464 = vmatpush3.msra.mxu0 %v295_v36 }
 0x1db   :  { %466 = vmatmul.mubr.msk.f32.vlgmr.msra.gmra.mxu0 %vm84_vm0, %v299_v37 }
 0x29b   :  { %v369_v38 = vpop.f32.mrf.mxu0 }
 0x29c   :  { %v407_v39 = vmul.f32 -1.442695, %v369_v38 }
 0x29d   :  { %v467_v40 = vpop.f32.mrf.mxu0 }
 0x29e   :  { %477 = vpow2.f32 %v407_v39 }
 0x2ab   :  { %v478_v41 = vpop.eup %477 }
 0x2ac   :  { %v376_v42 = vadd.f32 1.0, %v478_v41 }
 0x2ae   :  { %479 = vrcp.f32 %v376_v42 }
 0x2bb   :  { %v480_v43 = vpop.eup %479 }
 0x2bc   :  { %380 = vst.msk [vmem:[#allocation10] sm:$0x1] %vm379_vm2, %v480_v43 }
 0x2bd   :  { %572 = shalt.err (!%p569_p10)
}
 0x2be   :  { %390 = dma.vmem_to_hbm [thread:$0]  %s388_s14, 16, %s672_s5, [#allocation4]  }
 0x2bf   :  { %587 = dma.done.wait [#allocation4], 16  }
 0x2c0   :  { %588 = vsyncadd [#allocation4], 4294967280 }
 0x2c1   :  { %394 = vsyncpa [#allocation3], 1 }
 0x2c2   :  { %395 = vsyncpa [#allocation6], 1 }
 0x2c3   :  { %396 = vsyncpa [#allocation9], 1 }
 0x2c4   :  { %397 = vsyncpa [#allocation4], 1 }

</bundles_post_ra>
